<compile_context>
chip_gen: v7x
topology: tpu7x:2x2x1
jax: 0.10.0
libtpu: 0.0.40
codegen_flags: <defaults>
</compile_context>

<pallas_src>
import functools

import jax
import jax.numpy as jnp
from jax.experimental import pallas as pl
from jax.experimental.pallas import tpu as pltpu


def lstm_kernel(x_ref, w_ref, u_ref, b_ref, wfc_ref, bfc_ref, out_ref, *,
                seq_len, hidden):
    """LSTM recurrence + final Linear, fully VMEM-resident.

    x_ref  : (T*B, I)  time-major flattened input (f32)
    w_ref  : (I, 4H)   input->gate weights, gate order i, f, o, g
    u_ref  : (H, 4H)   hidden->gate weights, gate order i, f, o, g
    b_ref  : (1, 4H)   combined bias (b_ih + b_hh), gate order i, f, o, g
    wfc_ref: (1, H)    final Linear weight row
    bfc_ref: (1, 1)    final Linear bias (SMEM scalar)
    out_ref: (B, 1)
    """
    T = seq_len
    H = hidden

    x2d = x_ref[...]          # (T*B, I)
    w = w_ref[...]            # (I, 4H)
    u = u_ref[...]            # (H, 4H)
    b = b_ref[...]            # (1, 4H)

    TB = x2d.shape[0]
    B = TB // T

    # Hoisted input projection: one stacked matmul for all timesteps & gates.
    xp = jnp.dot(x2d, w, preferred_element_type=jnp.float32) + b   # (T*B, 4H)
    xp = xp.reshape(T, B, 4 * H)                                   # time-major

    h = jnp.zeros((B, H), jnp.float32)
    c = jnp.zeros((B, H), jnp.float32)

    # T is small & static -> unrolled; per-step critical path is one MXU push,
    # one wide sigmoid, one tanh, and the elementwise state update.
    for t in range(T):
        gates = xp[t] + jnp.dot(h, u, preferred_element_type=jnp.float32)  # (B, 4H)
        s = jax.nn.sigmoid(gates[:, : 3 * H])      # i, f, o (contiguous)
        g_g = jnp.tanh(gates[:, 3 * H:])           # g
        i_g = s[:, :H]
        f_g = s[:, H: 2 * H]
        o_g = s[:, 2 * H: 3 * H]
        c = f_g * c + i_g * g_g
        h = o_g * jnp.tanh(c)

    # Final Linear as VPU multiply + lane reduction (avoids 1-column MXU matmul).
    pred = jnp.sum(h * wfc_ref[...], axis=-1, keepdims=True) + bfc_ref[0, 0]
    out_ref[...] = pred.astype(out_ref.dtype)


def lstm_model_forward(x, w_ifgo, u_ifgo, b_ifgo, wfc, bfc):
    """x: (B, T, I); PyTorch-style params:
       w_ifgo (4, I, H), u_ifgo (4, H, H), b_ifgo (4, 1, H)  gate order i,f,g,o
       wfc (H, 1), bfc (1, 1)."""
    B, T, I = x.shape
    H = u_ifgo.shape[-1]

    # Layout plumbing in the wrapper (not on the kernel critical path):
    # gate re-order i,f,g,o -> i,f,o,g and fold gate axis into the lane dim.
    w_s = jnp.concatenate([w_ifgo[0], w_ifgo[1], w_ifgo[3], w_ifgo[2]], axis=-1)  # (I, 4H)
    u_s = jnp.concatenate([u_ifgo[0], u_ifgo[1], u_ifgo[3], u_ifgo[2]], axis=-1)  # (H, 4H)
    b_s = jnp.concatenate([b_ifgo[0], b_ifgo[1], b_ifgo[3], b_ifgo[2]], axis=-1)  # (1, 4H)
    wfc_row = wfc.reshape(1, H)                                                    # (1, H)
    x2d = jnp.transpose(x, (1, 0, 2)).reshape(T * B, I).astype(jnp.float32)        # time-major

    kernel = functools.partial(lstm_kernel, seq_len=T, hidden=H)
    return pl.pallas_call(
        kernel,
        out_shape=jax.ShapeDtypeStruct((B, 1), jnp.float32),
        in_specs=[
            pl.BlockSpec(memory_space=pltpu.MemorySpace.VMEM),   # x2d
            pl.BlockSpec(memory_space=pltpu.MemorySpace.VMEM),   # w_s
            pl.BlockSpec(memory_space=pltpu.MemorySpace.VMEM),   # u_s
            pl.BlockSpec(memory_space=pltpu.MemorySpace.VMEM),   # b_s
            pl.BlockSpec(memory_space=pltpu.MemorySpace.VMEM),   # wfc_row
            pl.BlockSpec(memory_space=pltpu.MemorySpace.SMEM),   # bfc scalar
        ],
        out_specs=pl.BlockSpec(memory_space=pltpu.MemorySpace.VMEM),
    )(x2d, w_s, u_s, b_s, wfc_row, bfc)
    # Note: no grid — at B=2 megacore/batch sharding is pointless. If B grows
    # (>=16 on v7x), add a batch grid axis with dimension_semantics=("parallel",).


def reference_forward(x, w, u, b, wfc, bfc):
    """Pure-JAX reference implementing nn.LSTM + nn.Linear semantics
    (PyTorch gate order i, f, g, o)."""
    B, T, I = x.shape
    H = u.shape[1]
    h = jnp.zeros((B, H), jnp.float32)
    c = jnp.zeros((B, H), jnp.float32)
    for t in range(T):
        xt = x[:, t, :]
        i_g = jax.nn.sigmoid(xt @ w[0] + h @ u[0] + b[0])
        f_g = jax.nn.sigmoid(xt @ w[1] + h @ u[1] + b[1])
        g_g = jnp.tanh(xt @ w[2] + h @ u[2] + b[2])
        o_g = jax.nn.sigmoid(xt @ w[3] + h @ u[3] + b[3])
        c = f_g * c + i_g * g_g
        h = o_g * jnp.tanh(c)
    return h @ wfc + bfc


if __name__ == "__main__":
    input_size = 3
    hidden_size = 50
    batch = 2
    seq = 8

    key = jax.random.PRNGKey(0)
    kx, kw, ku, kb1, kb2, kfw, kfb = jax.random.split(key, 7)

    # Deterministic param init, mimicking PyTorch's U(-1/sqrt(H), 1/sqrt(H)).
    bound = 1.0 / jnp.sqrt(jnp.float32(hidden_size))
    w = jax.random.uniform(kw, (4, input_size, hidden_size), jnp.float32, -bound, bound)
    u = jax.random.uniform(ku, (4, hidden_size, hidden_size), jnp.float32, -bound, bound)
    b_ih = jax.random.uniform(kb1, (4, 1, hidden_size), jnp.float32, -bound, bound)
    b_hh = jax.random.uniform(kb2, (4, 1, hidden_size), jnp.float32, -bound, bound)
    b = b_ih + b_hh
    wfc = jax.random.uniform(kfw, (hidden_size, 1), jnp.float32, -bound, bound)
    bfc = jax.random.uniform(kfb, (1, 1), jnp.float32, -bound, bound)

    x = jax.random.normal(kx, (batch, seq, input_size), jnp.float32)

    out = lstm_model_forward(x, w, u, b, wfc, bfc)
    out = jax.block_until_ready(out)

    ref = reference_forward(x, w, u, b, wfc, bfc)
    assert out.shape == (batch, 1)
    assert jnp.allclose(out, ref, atol=1e-4, rtol=1e-4), (out, ref)

    print("KERNEL_OK")
</pallas_src>

<mosaic_0001>
module attributes {stable_mosaic.version = 11 : i64} {
  func.func @lstm_kernel(%arg0: memref<16x3xf32, #tpu.memory_space<vmem>>, %arg1: memref<3x200xf32, #tpu.memory_space<vmem>>, %arg2: memref<50x200xf32, #tpu.memory_space<vmem>>, %arg3: memref<1x200xf32, #tpu.memory_space<vmem>>, %arg4: memref<1x50xf32, #tpu.memory_space<vmem>>, %arg5: memref<1x1xf32, #tpu.memory_space<smem>>, %arg6: memref<2x1xf32, #tpu.memory_space<vmem>>) attributes {dimension_semantics = [], scalar_prefetch = 0 : i64, scratch_operands = 0 : i64, tpu.core_type = #tpu.core_type<tc>} {
    %c0 = arith.constant 0 : index
    %c0_0 = arith.constant 0 : index
    %0 = vector.load %arg0[%c0, %c0_0] : memref<16x3xf32, #tpu.memory_space<vmem>>, vector<16x3xf32>
    %c0_1 = arith.constant 0 : index
    %c0_2 = arith.constant 0 : index
    %1 = vector.load %arg1[%c0_1, %c0_2] : memref<3x200xf32, #tpu.memory_space<vmem>>, vector<3x200xf32>
    %c0_3 = arith.constant 0 : index
    %c0_4 = arith.constant 0 : index
    %2 = vector.load %arg2[%c0_3, %c0_4] : memref<50x200xf32, #tpu.memory_space<vmem>>, vector<50x200xf32>
    %c0_5 = arith.constant 0 : index
    %c0_6 = arith.constant 0 : index
    %3 = vector.load %arg3[%c0_5, %c0_6] : memref<1x200xf32, #tpu.memory_space<vmem>>, vector<1x200xf32>
    %cst = arith.constant dense<0.000000e+00> : vector<16x200xf32>
    %4 = tpu.matmul %0, %1, %cst {dimension_numbers = #tpu.dot_dimension_numbers<[1], [0], [0], [1], [0, 0, 1, 1], [], []>} : vector<16x3xf32>, vector<3x200xf32>, vector<16x200xf32> -> vector<16x200xf32>
    %5 = vector.broadcast %3 : vector<1x200xf32> to vector<16x200xf32>
    %6 = arith.addf %4, %5 : vector<16x200xf32>
    %7 = vector.shape_cast %6 : vector<16x200xf32> to vector<8x2x200xf32>
    %cst_7 = arith.constant 0.000000e+00 : f32
    %8 = vector.broadcast %cst_7 : f32 to vector<2x50xf32>
    %cst_8 = arith.constant 0.000000e+00 : f32
    %9 = vector.broadcast %cst_8 : f32 to vector<2x50xf32>
    %10 = vector.extract_strided_slice %7 {offsets = [0, 0, 0], sizes = [1, 2, 200], strides = [1, 1, 1]} : vector<8x2x200xf32> to vector<1x2x200xf32>
    %11 = vector.shape_cast %10 : vector<1x2x200xf32> to vector<2x200xf32>
    %cst_9 = arith.constant dense<0.000000e+00> : vector<2x200xf32>
    %12 = tpu.matmul %8, %2, %cst_9 {dimension_numbers = #tpu.dot_dimension_numbers<[1], [0], [0], [1], [0, 0, 1, 1], [], []>} : vector<2x50xf32>, vector<50x200xf32>, vector<2x200xf32> -> vector<2x200xf32>
    %13 = arith.addf %11, %12 : vector<2x200xf32>
    %14 = vector.extract_strided_slice %13 {offsets = [0, 0], sizes = [2, 150], strides = [1, 1]} : vector<2x200xf32> to vector<2x150xf32>
    %15 = arith.negf %14 : vector<2x150xf32>
    %16 = math.exp %15 : vector<2x150xf32>
    %cst_10 = arith.constant 1.000000e+00 : f32
    %17 = vector.broadcast %cst_10 : f32 to vector<2x150xf32>
    %18 = arith.addf %17, %16 : vector<2x150xf32>
    %19 = arith.divf %17, %18 : vector<2x150xf32>
    %20 = vector.extract_strided_slice %13 {offsets = [0, 150], sizes = [2, 50], strides = [1, 1]} : vector<2x200xf32> to vector<2x50xf32>
    %21 = math.tanh %20 : vector<2x50xf32>
    %22 = vector.extract_strided_slice %19 {offsets = [0, 0], sizes = [2, 50], strides = [1, 1]} : vector<2x150xf32> to vector<2x50xf32>
    %23 = vector.extract_strided_slice %19 {offsets = [0, 50], sizes = [2, 50], strides = [1, 1]} : vector<2x150xf32> to vector<2x50xf32>
    %24 = vector.extract_strided_slice %19 {offsets = [0, 100], sizes = [2, 50], strides = [1, 1]} : vector<2x150xf32> to vector<2x50xf32>
    %25 = arith.mulf %23, %9 : vector<2x50xf32>
    %26 = arith.mulf %22, %21 : vector<2x50xf32>
    %27 = arith.addf %25, %26 : vector<2x50xf32>
    %28 = math.tanh %27 : vector<2x50xf32>
    %29 = arith.mulf %24, %28 : vector<2x50xf32>
    %30 = vector.extract_strided_slice %7 {offsets = [1, 0, 0], sizes = [1, 2, 200], strides = [1, 1, 1]} : vector<8x2x200xf32> to vector<1x2x200xf32>
    %31 = vector.shape_cast %30 : vector<1x2x200xf32> to vector<2x200xf32>
    %cst_11 = arith.constant dense<0.000000e+00> : vector<2x200xf32>
    %32 = tpu.matmul %29, %2, %cst_11 {dimension_numbers = #tpu.dot_dimension_numbers<[1], [0], [0], [1], [0, 0, 1, 1], [], []>} : vector<2x50xf32>, vector<50x200xf32>, vector<2x200xf32> -> vector<2x200xf32>
    %33 = arith.addf %31, %32 : vector<2x200xf32>
    %34 = vector.extract_strided_slice %33 {offsets = [0, 0], sizes = [2, 150], strides = [1, 1]} : vector<2x200xf32> to vector<2x150xf32>
    %35 = arith.negf %34 : vector<2x150xf32>
    %36 = math.exp %35 : vector<2x150xf32>
    %cst_12 = arith.constant 1.000000e+00 : f32
    %37 = vector.broadcast %cst_12 : f32 to vector<2x150xf32>
    %38 = arith.addf %37, %36 : vector<2x150xf32>
    %39 = arith.divf %37, %38 : vector<2x150xf32>
    %40 = vector.extract_strided_slice %33 {offsets = [0, 150], sizes = [2, 50], strides = [1, 1]} : vector<2x200xf32> to vector<2x50xf32>
    %41 = math.tanh %40 : vector<2x50xf32>
    %42 = vector.extract_strided_slice %39 {offsets = [0, 0], sizes = [2, 50], strides = [1, 1]} : vector<2x150xf32> to vector<2x50xf32>
    %43 = vector.extract_strided_slice %39 {offsets = [0, 50], sizes = [2, 50], strides = [1, 1]} : vector<2x150xf32> to vector<2x50xf32>
    %44 = vector.extract_strided_slice %39 {offsets = [0, 100], sizes = [2, 50], strides = [1, 1]} : vector<2x150xf32> to vector<2x50xf32>
    %45 = arith.mulf %43, %27 : vector<2x50xf32>
    %46 = arith.mulf %42, %41 : vector<2x50xf32>
    %47 = arith.addf %45, %46 : vector<2x50xf32>
    %48 = math.tanh %47 : vector<2x50xf32>
    %49 = arith.mulf %44, %48 : vector<2x50xf32>
    %50 = vector.extract_strided_slice %7 {offsets = [2, 0, 0], sizes = [1, 2, 200], strides = [1, 1, 1]} : vector<8x2x200xf32> to vector<1x2x200xf32>
    %51 = vector.shape_cast %50 : vector<1x2x200xf32> to vector<2x200xf32>
    %cst_13 = arith.constant dense<0.000000e+00> : vector<2x200xf32>
    %52 = tpu.matmul %49, %2, %cst_13 {dimension_numbers = #tpu.dot_dimension_numbers<[1], [0], [0], [1], [0, 0, 1, 1], [], []>} : vector<2x50xf32>, vector<50x200xf32>, vector<2x200xf32> -> vector<2x200xf32>
    %53 = arith.addf %51, %52 : vector<2x200xf32>
    %54 = vector.extract_strided_slice %53 {offsets = [0, 0], sizes = [2, 150], strides = [1, 1]} : vector<2x200xf32> to vector<2x150xf32>
    %55 = arith.negf %54 : vector<2x150xf32>
    %56 = math.exp %55 : vector<2x150xf32>
    %cst_14 = arith.constant 1.000000e+00 : f32
    %57 = vector.broadcast %cst_14 : f32 to vector<2x150xf32>
    %58 = arith.addf %57, %56 : vector<2x150xf32>
    %59 = arith.divf %57, %58 : vector<2x150xf32>
    %60 = vector.extract_strided_slice %53 {offsets = [0, 150], sizes = [2, 50], strides = [1, 1]} : vector<2x200xf32> to vector<2x50xf32>
    %61 = math.tanh %60 : vector<2x50xf32>
    %62 = vector.extract_strided_slice %59 {offsets = [0, 0], sizes = [2, 50], strides = [1, 1]} : vector<2x150xf32> to vector<2x50xf32>
    %63 = vector.extract_strided_slice %59 {offsets = [0, 50], sizes = [2, 50], strides = [1, 1]} : vector<2x150xf32> to vector<2x50xf32>
    %64 = vector.extract_strided_slice %59 {offsets = [0, 100], sizes = [2, 50], strides = [1, 1]} : vector<2x150xf32> to vector<2x50xf32>
    %65 = arith.mulf %63, %47 : vector<2x50xf32>
    %66 = arith.mulf %62, %61 : vector<2x50xf32>
    %67 = arith.addf %65, %66 : vector<2x50xf32>
    %68 = math.tanh %67 : vector<2x50xf32>
    %69 = arith.mulf %64, %68 : vector<2x50xf32>
    %70 = vector.extract_strided_slice %7 {offsets = [3, 0, 0], sizes = [1, 2, 200], strides = [1, 1, 1]} : vector<8x2x200xf32> to vector<1x2x200xf32>
    %71 = vector.shape_cast %70 : vector<1x2x200xf32> to vector<2x200xf32>
    %cst_15 = arith.constant dense<0.000000e+00> : vector<2x200xf32>
    %72 = tpu.matmul %69, %2, %cst_15 {dimension_numbers = #tpu.dot_dimension_numbers<[1], [0], [0], [1], [0, 0, 1, 1], [], []>} : vector<2x50xf32>, vector<50x200xf32>, vector<2x200xf32> -> vector<2x200xf32>
    %73 = arith.addf %71, %72 : vector<2x200xf32>
    %74 = vector.extract_strided_slice %73 {offsets = [0, 0], sizes = [2, 150], strides = [1, 1]} : vector<2x200xf32> to vector<2x150xf32>
    %75 = arith.negf %74 : vector<2x150xf32>
    %76 = math.exp %75 : vector<2x150xf32>
    %cst_16 = arith.constant 1.000000e+00 : f32
    %77 = vector.broadcast %cst_16 : f32 to vector<2x150xf32>
    %78 = arith.addf %77, %76 : vector<2x150xf32>
    %79 = arith.divf %77, %78 : vector<2x150xf32>
    %80 = vector.extract_strided_slice %73 {offsets = [0, 150], sizes = [2, 50], strides = [1, 1]} : vector<2x200xf32> to vector<2x50xf32>
    %81 = math.tanh %80 : vector<2x50xf32>
    %82 = vector.extract_strided_slice %79 {offsets = [0, 0], sizes = [2, 50], strides = [1, 1]} : vector<2x150xf32> to vector<2x50xf32>
    %83 = vector.extract_strided_slice %79 {offsets = [0, 50], sizes = [2, 50], strides = [1, 1]} : vector<2x150xf32> to vector<2x50xf32>
    %84 = vector.extract_strided_slice %79 {offsets = [0, 100], sizes = [2, 50], strides = [1, 1]} : vector<2x150xf32> to vector<2x50xf32>
    %85 = arith.mulf %83, %67 : vector<2x50xf32>
    %86 = arith.mulf %82, %81 : vector<2x50xf32>
    %87 = arith.addf %85, %86 : vector<2x50xf32>
    %88 = math.tanh %87 : vector<2x50xf32>
    %89 = arith.mulf %84, %88 : vector<2x50xf32>
    %90 = vector.extract_strided_slice %7 {offsets = [4, 0, 0], sizes = [1, 2, 200], strides = [1, 1, 1]} : vector<8x2x200xf32> to vector<1x2x200xf32>
    %91 = vector.shape_cast %90 : vector<1x2x200xf32> to vector<2x200xf32>
    %cst_17 = arith.constant dense<0.000000e+00> : vector<2x200xf32>
    %92 = tpu.matmul %89, %2, %cst_17 {dimension_numbers = #tpu.dot_dimension_numbers<[1], [0], [0], [1], [0, 0, 1, 1], [], []>} : vector<2x50xf32>, vector<50x200xf32>, vector<2x200xf32> -> vector<2x200xf32>
    %93 = arith.addf %91, %92 : vector<2x200xf32>
    %94 = vector.extract_strided_slice %93 {offsets = [0, 0], sizes = [2, 150], strides = [1, 1]} : vector<2x200xf32> to vector<2x150xf32>
    %95 = arith.negf %94 : vector<2x150xf32>
    %96 = math.exp %95 : vector<2x150xf32>
    %cst_18 = arith.constant 1.000000e+00 : f32
    %97 = vector.broadcast %cst_18 : f32 to vector<2x150xf32>
    %98 = arith.addf %97, %96 : vector<2x150xf32>
    %99 = arith.divf %97, %98 : vector<2x150xf32>
    %100 = vector.extract_strided_slice %93 {offsets = [0, 150], sizes = [2, 50], strides = [1, 1]} : vector<2x200xf32> to vector<2x50xf32>
    %101 = math.tanh %100 : vector<2x50xf32>
    %102 = vector.extract_strided_slice %99 {offsets = [0, 0], sizes = [2, 50], strides = [1, 1]} : vector<2x150xf32> to vector<2x50xf32>
    %103 = vector.extract_strided_slice %99 {offsets = [0, 50], sizes = [2, 50], strides = [1, 1]} : vector<2x150xf32> to vector<2x50xf32>
    %104 = vector.extract_strided_slice %99 {offsets = [0, 100], sizes = [2, 50], strides = [1, 1]} : vector<2x150xf32> to vector<2x50xf32>
    %105 = arith.mulf %103, %87 : vector<2x50xf32>
    %106 = arith.mulf %102, %101 : vector<2x50xf32>
    %107 = arith.addf %105, %106 : vector<2x50xf32>
    %108 = math.tanh %107 : vector<2x50xf32>
    %109 = arith.mulf %104, %108 : vector<2x50xf32>
    %110 = vector.extract_strided_slice %7 {offsets = [5, 0, 0], sizes = [1, 2, 200], strides = [1, 1, 1]} : vector<8x2x200xf32> to vector<1x2x200xf32>
    %111 = vector.shape_cast %110 : vector<1x2x200xf32> to vector<2x200xf32>
    %cst_19 = arith.constant dense<0.000000e+00> : vector<2x200xf32>
    %112 = tpu.matmul %109, %2, %cst_19 {dimension_numbers = #tpu.dot_dimension_numbers<[1], [0], [0], [1], [0, 0, 1, 1], [], []>} : vector<2x50xf32>, vector<50x200xf32>, vector<2x200xf32> -> vector<2x200xf32>
    %113 = arith.addf %111, %112 : vector<2x200xf32>
    %114 = vector.extract_strided_slice %113 {offsets = [0, 0], sizes = [2, 150], strides = [1, 1]} : vector<2x200xf32> to vector<2x150xf32>
    %115 = arith.negf %114 : vector<2x150xf32>
    %116 = math.exp %115 : vector<2x150xf32>
    %cst_20 = arith.constant 1.000000e+00 : f32
    %117 = vector.broadcast %cst_20 : f32 to vector<2x150xf32>
    %118 = arith.addf %117, %116 : vector<2x150xf32>
    %119 = arith.divf %117, %118 : vector<2x150xf32>
    %120 = vector.extract_strided_slice %113 {offsets = [0, 150], sizes = [2, 50], strides = [1, 1]} : vector<2x200xf32> to vector<2x50xf32>
    %121 = math.tanh %120 : vector<2x50xf32>
    %122 = vector.extract_strided_slice %119 {offsets = [0, 0], sizes = [2, 50], strides = [1, 1]} : vector<2x150xf32> to vector<2x50xf32>
    %123 = vector.extract_strided_slice %119 {offsets = [0, 50], sizes = [2, 50], strides = [1, 1]} : vector<2x150xf32> to vector<2x50xf32>
    %124 = vector.extract_strided_slice %119 {offsets = [0, 100], sizes = [2, 50], strides = [1, 1]} : vector<2x150xf32> to vector<2x50xf32>
    %125 = arith.mulf %123, %107 : vector<2x50xf32>
    %126 = arith.mulf %122, %121 : vector<2x50xf32>
    %127 = arith.addf %125, %126 : vector<2x50xf32>
    %128 = math.tanh %127 : vector<2x50xf32>
    %129 = arith.mulf %124, %128 : vector<2x50xf32>
    %130 = vector.extract_strided_slice %7 {offsets = [6, 0, 0], sizes = [1, 2, 200], strides = [1, 1, 1]} : vector<8x2x200xf32> to vector<1x2x200xf32>
    %131 = vector.shape_cast %130 : vector<1x2x200xf32> to vector<2x200xf32>
    %cst_21 = arith.constant dense<0.000000e+00> : vector<2x200xf32>
    %132 = tpu.matmul %129, %2, %cst_21 {dimension_numbers = #tpu.dot_dimension_numbers<[1], [0], [0], [1], [0, 0, 1, 1], [], []>} : vector<2x50xf32>, vector<50x200xf32>, vector<2x200xf32> -> vector<2x200xf32>
    %133 = arith.addf %131, %132 : vector<2x200xf32>
    %134 = vector.extract_strided_slice %133 {offsets = [0, 0], sizes = [2, 150], strides = [1, 1]} : vector<2x200xf32> to vector<2x150xf32>
    %135 = arith.negf %134 : vector<2x150xf32>
    %136 = math.exp %135 : vector<2x150xf32>
    %cst_22 = arith.constant 1.000000e+00 : f32
    %137 = vector.broadcast %cst_22 : f32 to vector<2x150xf32>
    %138 = arith.addf %137, %136 : vector<2x150xf32>
    %139 = arith.divf %137, %138 : vector<2x150xf32>
    %140 = vector.extract_strided_slice %133 {offsets = [0, 150], sizes = [2, 50], strides = [1, 1]} : vector<2x200xf32> to vector<2x50xf32>
    %141 = math.tanh %140 : vector<2x50xf32>
    %142 = vector.extract_strided_slice %139 {offsets = [0, 0], sizes = [2, 50], strides = [1, 1]} : vector<2x150xf32> to vector<2x50xf32>
    %143 = vector.extract_strided_slice %139 {offsets = [0, 50], sizes = [2, 50], strides = [1, 1]} : vector<2x150xf32> to vector<2x50xf32>
    %144 = vector.extract_strided_slice %139 {offsets = [0, 100], sizes = [2, 50], strides = [1, 1]} : vector<2x150xf32> to vector<2x50xf32>
    %145 = arith.mulf %143, %127 : vector<2x50xf32>
    %146 = arith.mulf %142, %141 : vector<2x50xf32>
    %147 = arith.addf %145, %146 : vector<2x50xf32>
    %148 = math.tanh %147 : vector<2x50xf32>
    %149 = arith.mulf %144, %148 : vector<2x50xf32>
    %150 = vector.extract_strided_slice %7 {offsets = [7, 0, 0], sizes = [1, 2, 200], strides = [1, 1, 1]} : vector<8x2x200xf32> to vector<1x2x200xf32>
    %151 = vector.shape_cast %150 : vector<1x2x200xf32> to vector<2x200xf32>
    %cst_23 = arith.constant dense<0.000000e+00> : vector<2x200xf32>
    %152 = tpu.matmul %149, %2, %cst_23 {dimension_numbers = #tpu.dot_dimension_numbers<[1], [0], [0], [1], [0, 0, 1, 1], [], []>} : vector<2x50xf32>, vector<50x200xf32>, vector<2x200xf32> -> vector<2x200xf32>
    %153 = arith.addf %151, %152 : vector<2x200xf32>
    %154 = vector.extract_strided_slice %153 {offsets = [0, 0], sizes = [2, 150], strides = [1, 1]} : vector<2x200xf32> to vector<2x150xf32>
    %155 = arith.negf %154 : vector<2x150xf32>
    %156 = math.exp %155 : vector<2x150xf32>
    %cst_24 = arith.constant 1.000000e+00 : f32
    %157 = vector.broadcast %cst_24 : f32 to vector<2x150xf32>
    %158 = arith.addf %157, %156 : vector<2x150xf32>
    %159 = arith.divf %157, %158 : vector<2x150xf32>
    %160 = vector.extract_strided_slice %153 {offsets = [0, 150], sizes = [2, 50], strides = [1, 1]} : vector<2x200xf32> to vector<2x50xf32>
    %161 = math.tanh %160 : vector<2x50xf32>
    %162 = vector.extract_strided_slice %159 {offsets = [0, 0], sizes = [2, 50], strides = [1, 1]} : vector<2x150xf32> to vector<2x50xf32>
    %163 = vector.extract_strided_slice %159 {offsets = [0, 50], sizes = [2, 50], strides = [1, 1]} : vector<2x150xf32> to vector<2x50xf32>
    %164 = vector.extract_strided_slice %159 {offsets = [0, 100], sizes = [2, 50], strides = [1, 1]} : vector<2x150xf32> to vector<2x50xf32>
    %165 = arith.mulf %163, %147 : vector<2x50xf32>
    %166 = arith.mulf %162, %161 : vector<2x50xf32>
    %167 = arith.addf %165, %166 : vector<2x50xf32>
    %168 = math.tanh %167 : vector<2x50xf32>
    %169 = arith.mulf %164, %168 : vector<2x50xf32>
    %c0_25 = arith.constant 0 : index
    %c0_26 = arith.constant 0 : index
    %170 = vector.load %arg4[%c0_25, %c0_26] : memref<1x50xf32, #tpu.memory_space<vmem>>, vector<1x50xf32>
    %171 = vector.broadcast %170 : vector<1x50xf32> to vector<2x50xf32>
    %172 = arith.mulf %169, %171 : vector<2x50xf32>
    %cst_27 = arith.constant dense<0.000000e+00> : vector<2xf32>
    %173 = vector.multi_reduction <add>, %172, %cst_27 [1] : vector<2x50xf32> to vector<2xf32>
    %174 = vector.shape_cast %173 : vector<2xf32> to vector<2x1xf32>
    %c0_28 = arith.constant 0 : index
    %c0_29 = arith.constant 0 : index
    %175 = memref.load %arg5[%c0_28, %c0_29] : memref<1x1xf32, #tpu.memory_space<smem>>
    %176 = vector.broadcast %175 : f32 to vector<2x1xf32>
    %177 = arith.addf %174, %176 : vector<2x1xf32>
    %c0_30 = arith.constant 0 : index
    %c0_31 = arith.constant 0 : index
    %178 = vector.load %arg6[%c0_30, %c0_31] : memref<2x1xf32, #tpu.memory_space<vmem>>, vector<2x1xf32>
    tpu.vector_store %arg6[%c0_30, %c0_31], %177 {strides = array<i32>} : memref<2x1xf32, #tpu.memory_space<vmem>>, vector<2x1xf32>,
    return
  }
}

</mosaic_0001>

<bundles_post_ra>
// kernel: tpu_custom_call.1
= control target key start
LH: loop header
LB: loop body
LE: loop exit
PB: predicated region body
PF: predicated region fallthrough
CT: control target
= control target key end

     0   :  { %12 = vsyncpa [#allocation4], 0  ;;  %s1489_s21 = smov [#allocation3]   ;;  %s1791_s0 = inlined_call_operand.vmem [shape: f32[16,3], index: 0, kind: input, shape index: {}]   ;;  %s1792_s1 = inlined_call_operand.vmem [shape: f32[3,200], index: 1, kind: input, shape index: {}]   ;;  %s1793_s2 = inlined_call_operand.hbm [shape: f32[50,200], index: 2, kind: input, shape index: {}]   ;;  %s1794_s3 = inlined_call_operand.vmem [shape: f32[1,200], index: 3, kind: input, shape index: {}]   ;;  %s1795_s4 = inlined_call_operand.vmem [shape: f32[1,50], index: 4, kind: input, shape index: {}]   ;;  %s1796_s5 = inlined_call_operand.<no memory space> [shape: f32[1,1], index: 5, kind: input, shape index: {}]   ;;  %s1797_s6 = inlined_call_operand.vmem [shape: f32[2,1], index: 6, kind: output, shape index: {}]  }
   0x1   :  { %s22_s22 = sshll.u32 %s1489_s21, 4  ;;  %s1465_s25 = scalar_lea.hbm %s1793_s2, 1792  ;;  %s23_s22 = int_to_ptr.vmem [resolvable:$true] %s22_s22 }
   0x2   :  { %p1466_p0 = scmp.ne.s32.totalorder %s1793_s2, %s1465_s25  ;;  %p1469_p1 = scmp.lt.u32.totalorder %s1465_s25, %s1793_s2 }
   0x4   :  { %p1471_p2 = pnand %p1469_p1, %p1466_p0 }
   0x6   :  { %1474 = shalt.err (!%p1471_p2)
}
   0x7   :  { %s1475_s30 = scalar_lea.vmem %s23_s22, 1792  ;;  %p1480_p4 = scmp.lt.s32.totalorder %s23_s22, %s23_s22 }
   0x8   :  { %p1476_p3 = scmp.ne.s32.totalorder %s23_s22, %s1475_s30  ;;  %p1481_p5 = scmp.lt.s32.totalorder %s1475_s30, %s1475_s30 }
   0xa   :  { %p1482_p6 = por %p1481_p5, %p1480_p4 }
   0xc   :  { %p1483_p7 = pnand %p1482_p6, %p1476_p3 }
   0xe   :  { %1486 = shalt.err (!%p1483_p7)
}
   0xf   :  { %s1490_s7 = smov 256   ;;  %s1491_s8 = smov 16  }
  0x10   :  { %28 = dma.hbm_to_vmem [thread:$0]  %s1793_s2, 1792, %s23_s22, [#allocation4], %s1490_s7, %s1490_s7, %s1491_s8  }
  0x11   :  { %1487 = dma.done.wait [#allocation4], 1792  }
  0x12   :  { %1488 = vsyncadd [#allocation4], 4294965504  ;;  %v1492_v0 = vmov 0.0   ;;  %v42_v1 = vld [vmem:[#allocation3 + $0x8] sm:$0xff]  ;;  %v44_v2 = vld [vmem:[#allocation3 + $0x18] sm:$0xff]  ;;  %vm76_vm0 = vcmask 1042432   ;;  %v57_v24 = vlaneseq }
  0x13   :  { %145 = vmatprep.mubr.f32.mxu0 %v1492_v0  ;;  %281 = vmatprep.mubr.f32.mxu1 %v1492_v0  ;;  %v41_v3 = vld [vmem:[#allocation3] sm:$0xff]  ;;  %v1547_v4 = vpack.c.bf16 %v44_v2, %v42_v1  ;;  %v43_v5 = vld [vmem:[#allocation3 + $0x10] sm:$0xff]  ;;  %v46_v6 = vld [vmem:[#allocation3 + $0x28] sm:$0xff]  ;;  %vm69_vm1 = vcmask 23552   ;;  %vm210_vm2 = vcmask 1041408   ;;  %s1495_s15 = smov 50  }
  0x14   :  { %v48_v7 = vld [vmem:[#allocation3 + $0x38] sm:$0xff]  ;;  %v1549_v8 = vpack.c.bf16 %v43_v5, %v41_v3  ;;  %v45_v10 = vld [vmem:[#allocation3 + $0x20] sm:$0xff]  ;;  %v47_v11 = vld [vmem:[#allocation3 + $0x30] sm:$0xff]  ;;  %v58_v25 = vshrl.u32 %v57_v24, 7  ;;  %v1493_v31 = vmov 1983009808  }
  0x15   :  { %v1551_v9 = vpack.c.bf16 %v48_v7, %v46_v6  ;;  %v50_v12 = vld [vmem:[#allocation3 + $0x48] sm:$0xff]  ;;  %1296 = vmatprep.subr.bf16.mxu1 %v1547_v4  ;;  %v52_v13 = vld [vmem:[#allocation3 + $0x58] sm:$0xff]  ;;  %v40_v14 = vld [vmem:[%s1792_s1] sm:$0x77]  ;;  %v1558_v15 = vpack.c.bf16 %v47_v11, %v45_v10  ;;  %v165_v32 = vunpack.c.l.s4 %v1493_v31  ;;  %vm206_vm3 = vcmask 408576   ;;  %s1496_s18 = smov 28  }
  0x16   :  { %1298 = vmatpush1.bf16.msra.mxu1 %v1549_v8  ;;  %v68_v16 = vcombine.high %v40_v14, %v40_v14  ;;  %v1561_v17 = vpack.c.bf16 %v52_v13, %v50_v12  ;;  %v49_v18 = vld [vmem:[#allocation3 + $0x40] sm:$0xff]  ;;  %v51_v19 = vld [vmem:[#allocation3 + $0x50] sm:$0xff]  ;;  %v1572_v22 = vld [vmem:[#allocation3 + $0x68] sm:$0x3]  ;;  %v59_v26 = vsub.s32 0, %v58_v25  ;;  %v63_v28 = vsub.s32 1, %v58_v25 }
  0x17   :  { %1300 = vmatprep.subr.bf16.mxu1 %v1551_v9  ;;  %v38_v20 = vld [vmem:[%s1791_s0] sm:$0xff]  ;;  %v1567_v21 = vpack.c.bf16 %v51_v19, %v49_v18  ;;  %v166_v37 = vunpack.c.0.s8 %v165_v32  ;;  %v39_v58 = vld [vmem:[%s1791_s0 + $0x8] sm:$0xff]  ;;  %vm340_vm4 = vcmask 228352   ;;  %s1497_s20 = smov 100   ;;  %vm1226_vm5 = vcmask 818176  }
  0x18   :  { %1259 = vmatprep.subr.msk.mxu0 %vm76_vm0, %v68_v16  ;;  %v1580_v23 = vld [vmem:[#allocation3 + $0x60] sm:$0x3]  ;;  %vm1245_vm6 = vcmask 402432   ;;  %vm1252_vm7 = vcmask 1024  }
  0x19   :  { %1260 = vmatpush1.msk.msra.mxu0 %vm76_vm0, %v40_v14  ;;  %v55_v27 = vld [vmem:[%s1794_s3] sm:$0x3]  ;;  %v1616_v40 = vsub.s32 %v166_v37, %v58_v25  ;;  %s1494_s3 = smov 106  }
  0x1a   :  { %1302 = vmatpush1.bf16.msra.mxu1 %v1558_v15  ;;  %1261 = vmatmul.mubr.msk.f32.vlgmr.msra.gmra.mrb[0].mxu0 %vm69_vm1, %v38_v20  ;;  %v60_v29 = vrot.slane %v55_v27, %v59_v26  ;;  %v64_v30 = vrot.slane %v55_v27, %v63_v28 }
  0x1b   :  { %1304 = vmatprep.subr.bf16.mxu1 %v1561_v17  ;;  %1308 = vmatprep.subr.bf16.mxu0 %v1547_v4 }
  0x1c   :  { %1310 = vmatpush1.bf16.msra.mxu0 %v1549_v8  ;;  %151 = vmatprep.mubr.f32.mxu0 %v1492_v0 }
  0x1d   :  { %1312 = vmatprep.subr.bf16.mxu0 %v1551_v9 }
  0x1e   :  { %1306 = vmatpush1.bf16.msra.mxu1 %v1567_v21  ;;  %1262 = vmatmul.mubr.msk.f32.gmra.mrb[2].mxu0 %vm69_vm1, %v39_v58 }
  0x1f   :  { %1263 = vmatprep.subr.msk.mxu1 %vm210_vm2, %v1572_v22  ;;  %408 = vmatprep.mubr.f32.mxu0 %v1492_v0 }
  0x20   :  { %1314 = vmatpush1.bf16.msra.mxu0 %v1558_v15 }
  0x21   :  { %1316 = vmatprep.subr.bf16.mxu0 %v1561_v17 }
  0x22   :  { %1264 = vmatpush1.msk.msra.mxu1 %vm210_vm2, %v1580_v23 }
  0x23   :  { %282 = vmatmul.mubr.f32.vlgmr.msra.gmra.mrb[0].mxu1 %v1492_v0  ;;  %1320 = vmatprep.subr.bf16.mxu1 %v1547_v4 }
  0x24   :  { %1318 = vmatpush1.bf16.msra.mxu0 %v1567_v21  ;;  %1322 = vmatpush1.bf16.msra.mxu1 %v1549_v8 }
  0x25   :  { %1266 = vmatprep.subr.msk.mxu0 %vm210_vm2, %v1572_v22  ;;  %1324 = vmatprep.subr.bf16.mxu1 %v1551_v9 }
  0x26   :  { %534 = vmatprep.mubr.f32.mxu1 %v1492_v0 }
  0x28   :  { %1267 = vmatpush1.msk.msra.mxu0 %vm210_vm2, %v1580_v23  ;;  %1326 = vmatpush1.bf16.msra.mxu1 %v1558_v15 }
  0x29   :  { %1328 = vmatprep.subr.bf16.mxu1 %v1561_v17  ;;  %1332 = vmatprep.subr.bf16.mxu0 %v1547_v4 }
  0x2c   :  { %1330 = vmatpush1.bf16.msra.mxu1 %v1567_v21 }
  0x2d   :  { %1270 = vmatprep.subr.msk.mxu1 %vm210_vm2, %v1572_v22 }
  0x30   :  { %1271 = vmatpush1.msk.msra.mxu1 %vm210_vm2, %v1580_v23 }
  0x31   :  { %1344 = vmatprep.subr.bf16.mxu1 %v1547_v4 }
  0xed   :  { %v147_v33 = vpop.f32.mrb[0].mxu0 }
  0xee   :  { %v1608_v34 = vadd.f32 %v147_v33, %v60_v29  ;;  %v149_v35 = vpop.f32.mrb[1].mxu0 }
  0xef   :  { %v1610_v36 = vadd.f32 %v149_v35, %v64_v30 }
  0xf1   :  { %v162_v38 = vcombine.low %v1608_v34, %v1610_v36  ;;  %v163_v39 = vcombine.high %v1608_v34, %v1610_v36  ;;  %v153_v3 = vpop.f32.mrb[2].mxu0 }
  0xf2   :  { %v1635_v5 = vadd.f32 %v153_v3, %v60_v29  ;;  %v155_v6 = vpop.f32.mrb[3].mxu0 }
  0xf3   :  { %v1619_v44 = vrot.slane %v162_v38, %v1616_v40  ;;  %v1637_v7 = vadd.f32 %v155_v6, %v64_v30 }
  0xf5   :  { %v180_v10 = vcombine.low %v1635_v5, %v1637_v7  ;;  %v181_v11 = vcombine.high %v1635_v5, %v1637_v7  ;;  %v178_v20 = vcombine.high %v1619_v44, %v1619_v44 }
  0xf6   :  { %v283_v41 = vpop.f32.mrb[0].mxu1 }
  0xf7   :  { %v285_v42 = vpop.f32.mrb[1].mxu1 }
  0xf8   :  { %v290_v43 = vcombine.low %v283_v41, %v285_v42 }
  0xfa   :  { %v297_v45 = vrot.slane %v290_v43, %v1616_v40 }
  0xfc   :  { %v299_v46 = vadd.f32 %v297_v45, %v1619_v44 }
  0xfe   :  { %307 = vrot.lane.b32.xlu0 %v299_v46, %s1494_s3  ;;  %v1265_v47 = vmul.f32 -1.442695, %v299_v46 }
 0x100   :  { %1401 = vpow2.f32 %v1265_v47 }
 0x10a   :  { %v1402_v48 = vpop.eup %1401 }
 0x10b   :  { %v303_v49 = vadd.f32 1.0, %v1402_v48 }
 0x10d   :  { %1403 = vrcp.f32 %v303_v49 }
 0x117   :  { %v1404_v52 = vpop.eup %1403 }
 0x118   :  { %v312_v55 = vmul.f32 0.0, %v1404_v52 }
 0x170   :  { %v308_v50 = vpop.permute.xlu0 %307 }
 0x171   :  { %v309_v51 = vrot.slane %v308_v50, 2 }
 0x173   :  { %1405 = vtanh.f32 %v309_v51 }
 0x17d   :  { %v1406_v53 = vpop.eup %1405 }
 0x17e   :  { %v313_v54 = vmul.f32 %v1406_v53, %v1404_v52 }
 0x180   :  { %315 = vrot.lane.b32.xlu0 %v313_v54, %s1495_s15  ;;  %v177_v54 = vrot.slane %v163_v39, %v1616_v40 }
 0x1f2   :  { %v316_v56 = vpop.permute.xlu0 %315 }
 0x1f3   :  { %v318_v57 = vadd.f32 %v316_v56, %v312_v55 }
 0x1f5   :  { %1407 = vtanh.f32 %v318_v57 }
 0x1ff   :  { %v1408_v59 = vpop.eup %1407 }
 0x200   :  { %321 = vrot.lane.b32.xlu1 %v1408_v59, %s1495_s15 }
 0x272   :  { %v322_v60 = vpop.permute.xlu1 %321 }
 0x273   :  { %v323_v61 = vrot.slane %v322_v60, 6 }
 0x275   :  { %v324_v62 = vsel %vm206_vm3, %v323_v61, %v322_v60 }
 0x276   :  { %v326_v63 = vmul.f32 %v1404_v52, %v324_v62 }
 0x278   :  { %v334_v1 = vrot.slane %v326_v63, %v1616_v40 }
 0x27a   :  { %336 = vrot.lane.b32.xlu1 %v334_v1, %s1496_s18  ;;  %v335_v2 = vcombine.high %v334_v1, %v334_v1 }
 0x27c   :  { %338 = vrot.lane.b32.xlu0 %v335_v2, %s1496_s18 }
 0x2ec   :  { %v337_v12 = vpop.permute.xlu1 %336 }
 0x2ee   :  { %v339_v13 = vpop.permute.xlu0 %338 }
 0x2ef   :  { %v341_v14 = vsel %vm340_vm4, %v337_v12, %v339_v13 }
 0x2f0   :  { %1268 = vmatmul.mubr.msk.f32.vlgmr.msra.gmra.mrb[4].mxu0 %vm206_vm3, %v341_v14 }
 0x2f1   :  { %1334 = vmatpush1.bf16.msra.mxu0 %v1549_v8  ;;  %660 = vmatprep.mubr.f32.mxu0 %v1492_v0 }
 0x2f2   :  { %1336 = vmatprep.subr.bf16.mxu0 %v1551_v9 }
 0x2f5   :  { %1338 = vmatpush1.bf16.msra.mxu0 %v1558_v15 }
 0x2f6   :  { %1340 = vmatprep.subr.bf16.mxu0 %v1561_v17 }
 0x2f9   :  { %1342 = vmatpush1.bf16.msra.mxu0 %v1567_v21 }
 0x2fa   :  { %1274 = vmatprep.subr.msk.mxu0 %vm210_vm2, %v1572_v22 }
 0x2fd   :  { %1275 = vmatpush1.msk.msra.mxu0 %vm210_vm2, %v1580_v23 }
 0x2fe   :  { %1356 = vmatprep.subr.bf16.mxu0 %v1547_v4 }
 0x3c3   :  { %v410_v16 = vpop.f32.mrb[4].mxu0 }
 0x3c4   :  { %v412_v18 = vpop.f32.mrb[5].mxu0 }
 0x3c5   :  { %v417_v19 = vcombine.low %v410_v16, %v412_v18 }
 0x3c7   :  { %v424_v24 = vrot.slane %v417_v19, %v1616_v40 }
 0x3c9   :  { %v426_v25 = vadd.f32 %v424_v24, %v178_v20 }
 0x3cb   :  { %434 = vrot.lane.b32.xlu1 %v426_v25, %s1494_s3  ;;  %v1269_v26 = vmul.f32 -1.442695, %v426_v25 }
 0x3cd   :  { %1409 = vpow2.f32 %v1269_v26 }
 0x3d7   :  { %v1410_v27 = vpop.eup %1409 }
 0x3d8   :  { %v430_v28 = vadd.f32 1.0, %v1410_v27 }
 0x3da   :  { %1411 = vrcp.f32 %v430_v28  ;;  %v179_v28 = vcombine.high %v177_v54, %v177_v54 }
 0x3e4   :  { %v1412_v31 = vpop.eup %1411 }
 0x3e5   :  { %v439_v35 = vmul.f32 %v1412_v31, %v318_v57 }
 0x43d   :  { %v435_v29 = vpop.permute.xlu1 %434 }
 0x43e   :  { %v436_v30 = vrot.slane %v435_v29, 2 }
 0x440   :  { %1413 = vtanh.f32 %v436_v30 }
 0x44a   :  { %v1414_v32 = vpop.eup %1413 }
 0x44b   :  { %v440_v33 = vmul.f32 %v1414_v32, %v1412_v31 }
 0x44d   :  { %442 = vrot.lane.b32.xlu0 %v440_v33, %s1495_s15 }
 0x4bf   :  { %v443_v37 = vpop.permute.xlu0 %442 }
 0x4c0   :  { %v445_v38 = vadd.f32 %v443_v37, %v439_v35 }
 0x4c2   :  { %1415 = vtanh.f32 %v445_v38 }
 0x4cc   :  { %v1416_v41 = vpop.eup %1415 }
 0x4cd   :  { %448 = vrot.lane.b32.xlu1 %v1416_v41, %s1495_s15 }
 0x53f   :  { %v449_v42 = vpop.permute.xlu1 %448 }
 0x540   :  { %v450_v43 = vrot.slane %v449_v42, 6 }
 0x542   :  { %v451_v44 = vsel %vm206_vm3, %v450_v43, %v449_v42 }
 0x543   :  { %v453_v45 = vmul.f32 %v1412_v31, %v451_v44 }
 0x545   :  { %v461_v46 = vrot.slane %v453_v45, %v1616_v40 }
 0x547   :  { %463 = vrot.lane.b32.xlu0 %v461_v46, %s1496_s18  ;;  %v462_v47 = vcombine.high %v461_v46, %v461_v46 }
 0x549   :  { %465 = vrot.lane.b32.xlu1 %v462_v47, %s1496_s18 }
 0x5b9   :  { %v464_v48 = vpop.permute.xlu0 %463 }
 0x5bb   :  { %v466_v49 = vpop.permute.xlu1 %465 }
 0x5bc   :  { %v467_v50 = vsel %vm340_vm4, %v464_v48, %v466_v49 }
 0x5bd   :  { %1272 = vmatmul.mubr.msk.f32.vlgmr.msra.gmra.mrb[2].mxu1 %vm206_vm3, %v467_v50 }
 0x5be   :  { %1346 = vmatpush1.bf16.msra.mxu1 %v1549_v8  ;;  %786 = vmatprep.mubr.f32.mxu1 %v1492_v0 }
 0x5bf   :  { %1348 = vmatprep.subr.bf16.mxu1 %v1551_v9 }
 0x5c2   :  { %1350 = vmatpush1.bf16.msra.mxu1 %v1558_v15 }
 0x5c3   :  { %1352 = vmatprep.subr.bf16.mxu1 %v1561_v17 }
 0x5c6   :  { %1354 = vmatpush1.bf16.msra.mxu1 %v1567_v21 }
 0x5c7   :  { %1278 = vmatprep.subr.msk.mxu1 %vm210_vm2, %v1572_v22 }
 0x5ca   :  { %1279 = vmatpush1.msk.msra.mxu1 %vm210_vm2, %v1580_v23 }
 0x5cb   :  { %1368 = vmatprep.subr.bf16.mxu1 %v1547_v4 }
 0x690   :  { %v536_v51 = vpop.f32.mrb[2].mxu1 }
 0x691   :  { %v538_v52 = vpop.f32.mrb[3].mxu1 }
 0x692   :  { %v543_v53 = vcombine.low %v536_v51, %v538_v52 }
 0x694   :  { %v550_v55 = vrot.slane %v543_v53, %v1616_v40 }
 0x696   :  { %v552_v56 = vadd.f32 %v550_v55, %v177_v54 }
 0x698   :  { %560 = vrot.lane.b32.xlu0 %v552_v56, %s1494_s3  ;;  %v1273_v57 = vmul.f32 -1.442695, %v552_v56 }
 0x69a   :  { %1417 = vpow2.f32 %v1273_v57  ;;  %v188_v57 = vrot.slane %v180_v10, %v1616_v40 }
 0x6a4   :  { %v1418_v58 = vpop.eup %1417 }
 0x6a5   :  { %v556_v59 = vadd.f32 1.0, %v1418_v58 }
 0x6a7   :  { %1419 = vrcp.f32 %v556_v59 }
 0x6b1   :  { %v1420_v62 = vpop.eup %1419 }
 0x6b2   :  { %v565_v34 = vmul.f32 %v1420_v62, %v445_v38 }
 0x70a   :  { %v561_v60 = vpop.permute.xlu0 %560 }
 0x70b   :  { %v562_v61 = vrot.slane %v561_v60, 2 }
 0x70d   :  { %1421 = vtanh.f32 %v562_v61 }
 0x717   :  { %v1422_v63 = vpop.eup %1421 }
 0x718   :  { %v566_v1 = vmul.f32 %v1422_v63, %v1420_v62 }
 0x71a   :  { %568 = vrot.lane.b32.xlu1 %v566_v1, %s1495_s15 }
 0x78c   :  { %v569_v36 = vpop.permute.xlu1 %568 }
 0x78d   :  { %v571_v39 = vadd.f32 %v569_v36, %v565_v34 }
 0x78f   :  { %1423 = vtanh.f32 %v571_v39 }
 0x799   :  { %v1424_v2 = vpop.eup %1423 }
 0x79a   :  { %574 = vrot.lane.b32.xlu0 %v1424_v2, %s1495_s15 }
 0x80c   :  { %v575_v3 = vpop.permute.xlu0 %574 }
 0x80d   :  { %v576_v6 = vrot.slane %v575_v3, 6 }
 0x80f   :  { %v577_v12 = vsel %vm206_vm3, %v576_v6, %v575_v3 }
 0x810   :  { %v579_v13 = vmul.f32 %v1420_v62, %v577_v12 }
 0x812   :  { %v587_v14 = vrot.slane %v579_v13, %v1616_v40 }
 0x814   :  { %589 = vrot.lane.b32.xlu1 %v587_v14, %s1496_s18  ;;  %v588_v16 = vcombine.high %v587_v14, %v587_v14 }
 0x816   :  { %591 = vrot.lane.b32.xlu0 %v588_v16, %s1496_s18 }
 0x886   :  { %v590_v18 = vpop.permute.xlu1 %589 }
 0x888   :  { %v592_v19 = vpop.permute.xlu0 %591 }
 0x889   :  { %v593_v20 = vsel %vm340_vm4, %v590_v18, %v592_v19 }
 0x88a   :  { %1276 = vmatmul.mubr.msk.f32.vlgmr.msra.gmra.mrb[6].mxu0 %vm206_vm3, %v593_v20 }
 0x88b   :  { %1358 = vmatpush1.bf16.msra.mxu0 %v1549_v8  ;;  %912 = vmatprep.mubr.f32.mxu0 %v1492_v0 }
 0x88c   :  { %1360 = vmatprep.subr.bf16.mxu0 %v1551_v9 }
 0x88f   :  { %1362 = vmatpush1.bf16.msra.mxu0 %v1558_v15 }
 0x890   :  { %1364 = vmatprep.subr.bf16.mxu0 %v1561_v17 }
 0x893   :  { %1366 = vmatpush1.bf16.msra.mxu0 %v1567_v21 }
 0x894   :  { %1282 = vmatprep.subr.msk.mxu0 %vm210_vm2, %v1572_v22 }
 0x897   :  { %1283 = vmatpush1.msk.msra.mxu0 %vm210_vm2, %v1580_v23 }
 0x898   :  { %1380 = vmatprep.subr.bf16.mxu0 %v1547_v4 }
 0x95d   :  { %v662_v24 = vpop.f32.mrb[6].mxu0 }
 0x95e   :  { %v664_v25 = vpop.f32.mrb[7].mxu0 }
 0x95f   :  { %v669_v26 = vcombine.low %v662_v24, %v664_v25 }
 0x961   :  { %v676_v27 = vrot.slane %v669_v26, %v1616_v40 }
 0x963   :  { %v678_v29 = vadd.f32 %v676_v27, %v179_v28 }
 0x965   :  { %686 = vrot.lane.b32.xlu1 %v678_v29, %s1494_s3  ;;  %v1277_v30 = vmul.f32 -1.442695, %v678_v29 }
 0x967   :  { %1425 = vpow2.f32 %v1277_v30 }
 0x971   :  { %v1426_v31 = vpop.eup %1425 }
 0x972   :  { %v682_v32 = vadd.f32 1.0, %v1426_v31 }
 0x974   :  { %1427 = vrcp.f32 %v682_v32 }
 0x97e   :  { %v1428_v37 = vpop.eup %1427 }
 0x97f   :  { %v691_v41 = vmul.f32 %v1428_v37, %v571_v39 }
 0x9d7   :  { %v687_v33 = vpop.permute.xlu1 %686 }
 0x9d8   :  { %v688_v35 = vrot.slane %v687_v33, 2 }
 0x9da   :  { %1429 = vtanh.f32 %v688_v35 }
 0x9e4   :  { %v1430_v38 = vpop.eup %1429 }
 0x9e5   :  { %v692_v4 = vmul.f32 %v1430_v38, %v1428_v37 }
 0x9e7   :  { %694 = vrot.lane.b32.xlu0 %v692_v4, %s1495_s15 }
 0xa59   :  { %v695_v42 = vpop.permute.xlu0 %694 }
 0xa5a   :  { %v697_v43 = vadd.f32 %v695_v42, %v691_v41 }
 0xa5c   :  { %1431 = vtanh.f32 %v697_v43 }
 0xa66   :  { %v1432_v44 = vpop.eup %1431 }
 0xa67   :  { %700 = vrot.lane.b32.xlu1 %v1432_v44, %s1495_s15 }
 0xad9   :  { %v701_v45 = vpop.permute.xlu1 %700 }
 0xada   :  { %v702_v46 = vrot.slane %v701_v45, 6 }
 0xadc   :  { %v703_v47 = vsel %vm206_vm3, %v702_v46, %v701_v45 }
 0xadd   :  { %v705_v48 = vmul.f32 %v1428_v37, %v703_v47 }
 0xadf   :  { %v713_v49 = vrot.slane %v705_v48, %v1616_v40 }
 0xae1   :  { %715 = vrot.lane.b32.xlu0 %v713_v49, %s1496_s18  ;;  %v714_v50 = vcombine.high %v713_v49, %v713_v49 }
 0xae3   :  { %717 = vrot.lane.b32.xlu1 %v714_v50, %s1496_s18 }
 0xb53   :  { %v716_v51 = vpop.permute.xlu0 %715 }
 0xb55   :  { %v718_v52 = vpop.permute.xlu1 %717 }
 0xb56   :  { %v719_v53 = vsel %vm340_vm4, %v716_v51, %v718_v52  ;;  %v195_v51 = vrot.slane %v181_v11, %v1616_v40 }
 0xb57   :  { %1280 = vmatmul.mubr.msk.f32.vlgmr.msra.gmra.mrb[4].mxu1 %vm206_vm3, %v719_v53 }
 0xb58   :  { %1370 = vmatpush1.bf16.msra.mxu1 %v1549_v8  ;;  %1038 = vmatprep.mubr.f32.mxu1 %v1492_v0 }
 0xb59   :  { %1372 = vmatprep.subr.bf16.mxu1 %v1551_v9 }
 0xb5c   :  { %1374 = vmatpush1.bf16.msra.mxu1 %v1558_v15 }
 0xb5d   :  { %1376 = vmatprep.subr.bf16.mxu1 %v1561_v17 }
 0xb60   :  { %1378 = vmatpush1.bf16.msra.mxu1 %v1567_v21 }
 0xb61   :  { %1286 = vmatprep.subr.msk.mxu1 %vm210_vm2, %v1572_v22 }
 0xb64   :  { %1287 = vmatpush1.msk.msra.mxu1 %vm210_vm2, %v1580_v23 }
 0xc2a   :  { %v788_v54 = vpop.f32.mrb[4].mxu1 }
 0xc2b   :  { %v790_v55 = vpop.f32.mrb[5].mxu1 }
 0xc2c   :  { %v795_v56 = vcombine.low %v788_v54, %v790_v55 }
 0xc2e   :  { %v802_v58 = vrot.slane %v795_v56, %v1616_v40 }
 0xc30   :  { %v804_v59 = vadd.f32 %v802_v58, %v188_v57 }
 0xc32   :  { %812 = vrot.lane.b32.xlu0 %v804_v59, %s1494_s3  ;;  %v1281_v60 = vmul.f32 -1.442695, %v804_v59 }
 0xc34   :  { %1433 = vpow2.f32 %v1281_v60 }
 0xc3e   :  { %v1434_v61 = vpop.eup %1433 }
 0xc3f   :  { %v808_v62 = vadd.f32 1.0, %v1434_v61 }
 0xc41   :  { %1435 = vrcp.f32 %v808_v62 }
 0xc4b   :  { %v1436_v34 = vpop.eup %1435 }
 0xc4c   :  { %v817_v2 = vmul.f32 %v1436_v34, %v697_v43 }
 0xca4   :  { %v813_v63 = vpop.permute.xlu0 %812 }
 0xca5   :  { %v814_v1 = vrot.slane %v813_v63, 2 }
 0xca7   :  { %1437 = vtanh.f32 %v814_v1 }
 0xcb1   :  { %v1438_v36 = vpop.eup %1437 }
 0xcb2   :  { %v818_v39 = vmul.f32 %v1438_v36, %v1436_v34 }
 0xcb4   :  { %820 = vrot.lane.b32.xlu1 %v818_v39, %s1495_s15 }
 0xd26   :  { %v821_v10 = vpop.permute.xlu1 %820 }
 0xd27   :  { %v823_v3 = vadd.f32 %v821_v10, %v817_v2 }
 0xd29   :  { %1439 = vtanh.f32 %v823_v3 }
 0xd33   :  { %v1440_v6 = vpop.eup %1439 }
 0xd34   :  { %826 = vrot.lane.b32.xlu0 %v1440_v6, %s1495_s15 }
 0xda6   :  { %v827_v12 = vpop.permute.xlu0 %826 }
 0xda7   :  { %v828_v13 = vrot.slane %v827_v12, 6 }
 0xda9   :  { %v829_v14 = vsel %vm206_vm3, %v828_v13, %v827_v12 }
 0xdaa   :  { %v831_v16 = vmul.f32 %v1436_v34, %v829_v14 }
 0xdac   :  { %v839_v18 = vrot.slane %v831_v16, %v1616_v40 }
 0xdae   :  { %841 = vrot.lane.b32.xlu1 %v839_v18, %s1496_s18  ;;  %v840_v19 = vcombine.high %v839_v18, %v839_v18  ;;  %v197_v18 = vcombine.high %v195_v51, %v195_v51 }
 0xdb0   :  { %843 = vrot.lane.b32.xlu0 %v840_v19, %s1496_s18 }
 0xe20   :  { %v842_v20 = vpop.permute.xlu1 %841 }
 0xe22   :  { %v844_v24 = vpop.permute.xlu0 %843 }
 0xe23   :  { %v845_v25 = vsel %vm340_vm4, %v842_v20, %v844_v24 }
 0xe24   :  { %1284 = vmatmul.mubr.msk.f32.vlgmr.msra.gmra.mrb[8].mxu0 %vm206_vm3, %v845_v25 }
 0xe25   :  { %1382 = vmatpush1.bf16.msra.mxu0 %v1549_v8  ;;  %1164 = vmatprep.mubr.f32.mxu0 %v1492_v0  ;;  %v196_v0 = vcombine.high %v188_v57, %v188_v57 }
 0xe26   :  { %1384 = vmatprep.subr.bf16.mxu0 %v1551_v9 }
 0xe29   :  { %1386 = vmatpush1.bf16.msra.mxu0 %v1558_v15 }
 0xe2a   :  { %1388 = vmatprep.subr.bf16.mxu0 %v1561_v17 }
 0xe2d   :  { %1390 = vmatpush1.bf16.msra.mxu0 %v1567_v21 }
 0xe2e   :  { %1290 = vmatprep.subr.msk.mxu0 %vm210_vm2, %v1572_v22 }
 0xe31   :  { %1291 = vmatpush1.msk.msra.mxu0 %vm210_vm2, %v1580_v23 }
 0xef7   :  { %v914_v26 = vpop.f32.mrb[8].mxu0 }
 0xef8   :  { %v916_v27 = vpop.f32.mrb[9].mxu0 }
 0xef9   :  { %v921_v28 = vcombine.low %v914_v26, %v916_v27 }
 0xefb   :  { %v928_v8 = vrot.slane %v921_v28, %v1616_v40 }
 0xefd   :  { %v930_v29 = vadd.f32 %v928_v8, %v196_v0  ;;  %v1294_v0 = vld [vmem:[%s1795_s4] ss:$0 sm:$0xff] }
 0xeff   :  { %938 = vrot.lane.b32.xlu1 %v930_v29, %s1494_s3  ;;  %v1285_v9 = vmul.f32 -1.442695, %v930_v29 }
 0xf01   :  { %1441 = vpow2.f32 %v1285_v9  ;;  %v1222_v9 = vrot.slane %v1294_v0, %v1616_v40 }
 0xf0b   :  { %v1442_v15 = vpop.eup %1441 }
 0xf0c   :  { %v934_v17 = vadd.f32 1.0, %v1442_v15 }
 0xf0e   :  { %1443 = vrcp.f32 %v934_v17 }
 0xf18   :  { %v1444_v22 = vpop.eup %1443 }
 0xf19   :  { %v943_v32 = vmul.f32 %v1444_v22, %v823_v3 }
 0xf71   :  { %v939_v21 = vpop.permute.xlu1 %938 }
 0xf72   :  { %v940_v30 = vrot.slane %v939_v21, 2 }
 0xf74   :  { %1445 = vtanh.f32 %v940_v30 }
 0xf7e   :  { %v1446_v31 = vpop.eup %1445 }
 0xf7f   :  { %v944_v23 = vmul.f32 %v1446_v31, %v1444_v22 }
 0xf81   :  { %946 = vrot.lane.b32.xlu0 %v944_v23, %s1495_s15 }
 0xff3   :  { %v947_v33 = vpop.permute.xlu0 %946 }
 0xff4   :  { %v949_v35 = vadd.f32 %v947_v33, %v943_v32 }
 0xff6   :  { %1447 = vtanh.f32 %v949_v35 }
0x1000   :  { %v1448_v37 = vpop.eup %1447 }
0x1001   :  { %952 = vrot.lane.b32.xlu1 %v1448_v37, %s1495_s15 }
0x1073   :  { %v953_v38 = vpop.permute.xlu1 %952 }
0x1074   :  { %v954_v4 = vrot.slane %v953_v38, 6 }
0x1076   :  { %v955_v41 = vsel %vm206_vm3, %v954_v4, %v953_v38 }
0x1077   :  { %v957_v42 = vmul.f32 %v1444_v22, %v955_v41 }
0x1079   :  { %v965_v43 = vrot.slane %v957_v42, %v1616_v40 }
0x107b   :  { %967 = vrot.lane.b32.xlu0 %v965_v43, %s1496_s18  ;;  %v966_v44 = vcombine.high %v965_v43, %v965_v43 }
0x107d   :  { %969 = vrot.lane.b32.xlu1 %v966_v44, %s1496_s18 }
0x10ed   :  { %v968_v45 = vpop.permute.xlu0 %967 }
0x10ef   :  { %v970_v46 = vpop.permute.xlu1 %969 }
0x10f0   :  { %v971_v47 = vsel %vm340_vm4, %v968_v45, %v970_v46  ;;  %v1250_v46 = vstv %s1796_s5 }
0x10f1   :  { %1288 = vmatmul.mubr.msk.f32.vlgmr.msra.gmra.mrb[6].mxu1 %vm206_vm3, %v971_v47 }
0x11c4   :  { %v1040_v48 = vpop.f32.mrb[6].mxu1 }
0x11c5   :  { %v1042_v49 = vpop.f32.mrb[7].mxu1 }
0x11c6   :  { %v1047_v50 = vcombine.low %v1040_v48, %v1042_v49 }
0x11c8   :  { %v1054_v52 = vrot.slane %v1047_v50, %v1616_v40 }
0x11ca   :  { %v1056_v53 = vadd.f32 %v1054_v52, %v195_v51 }
0x11cc   :  { %1064 = vrot.lane.b32.xlu0 %v1056_v53, %s1494_s3  ;;  %v1289_v54 = vmul.f32 -1.442695, %v1056_v53 }
0x11ce   :  { %1449 = vpow2.f32 %v1289_v54 }
0x11d8   :  { %v1450_v55 = vpop.eup %1449 }
0x11d9   :  { %v1060_v56 = vadd.f32 1.0, %v1450_v55 }
0x11db   :  { %1451 = vrcp.f32 %v1060_v56 }
0x11e5   :  { %v1452_v59 = vpop.eup %1451 }
0x11e6   :  { %v1069_v5 = vmul.f32 %v1452_v59, %v949_v35 }
0x123e   :  { %v1065_v57 = vpop.permute.xlu0 %1064 }
0x123f   :  { %v1066_v58 = vrot.slane %v1065_v57, 2 }
0x1241   :  { %1453 = vtanh.f32 %v1066_v58 }
0x124b   :  { %v1454_v60 = vpop.eup %1453 }
0x124c   :  { %v1070_v61 = vmul.f32 %v1454_v60, %v1452_v59 }
0x124e   :  { %1072 = vrot.lane.b32.xlu1 %v1070_v61, %s1495_s15 }
0x12c0   :  { %v1073_v7 = vpop.permute.xlu1 %1072 }
0x12c1   :  { %v1075_v11 = vadd.f32 %v1073_v7, %v1069_v5 }
0x12c3   :  { %1455 = vtanh.f32 %v1075_v11 }
0x12cd   :  { %v1456_v62 = vpop.eup %1455 }
0x12ce   :  { %1078 = vrot.lane.b32.xlu0 %v1456_v62, %s1495_s15 }
0x1340   :  { %v1079_v63 = vpop.permute.xlu0 %1078 }
0x1341   :  { %v1080_v1 = vrot.slane %v1079_v63, 6 }
0x1343   :  { %v1081_v34 = vsel %vm206_vm3, %v1080_v1, %v1079_v63 }
0x1344   :  { %v1083_v36 = vmul.f32 %v1452_v59, %v1081_v34 }
0x1346   :  { %v1091_v39 = vrot.slane %v1083_v36, %v1616_v40 }
0x1348   :  { %1093 = vrot.lane.b32.xlu1 %v1091_v39, %s1496_s18  ;;  %v1092_v2 = vcombine.high %v1091_v39, %v1091_v39 }
0x134a   :  { %1095 = vrot.lane.b32.xlu0 %v1092_v2, %s1496_s18 }
0x13ba   :  { %v1094_v10 = vpop.permute.xlu1 %1093 }
0x13bc   :  { %v1096_v3 = vpop.permute.xlu0 %1095 }
0x13bd   :  { %v1097_v6 = vsel %vm340_vm4, %v1094_v10, %v1096_v3 }
0x13be   :  { %1292 = vmatmul.mubr.msk.f32.vlgmr.msra.gmra.mrb[10].mxu0 %vm206_vm3, %v1097_v6 }
0x1491   :  { %v1166_v12 = vpop.f32.mrb[10].mxu0 }
0x1492   :  { %v1168_v13 = vpop.f32.mrb[11].mxu0 }
0x1493   :  { %v1173_v14 = vcombine.low %v1166_v12, %v1168_v13 }
0x1495   :  { %v1180_v16 = vrot.slane %v1173_v14, %v1616_v40 }
0x1497   :  { %v1182_v19 = vadd.f32 %v1180_v16, %v197_v18 }
0x1499   :  { %1190 = vrot.lane.b32.xlu1 %v1182_v19, %s1494_s3  ;;  %v1293_v20 = vmul.f32 -1.442695, %v1182_v19 }
0x149b   :  { %1457 = vpow2.f32 %v1293_v20 }
0x14a5   :  { %v1458_v24 = vpop.eup %1457 }
0x14a6   :  { %v1186_v25 = vadd.f32 1.0, %v1458_v24 }
0x14a8   :  { %1459 = vrcp.f32 %v1186_v25 }
0x14b2   :  { %v1460_v28 = vpop.eup %1459 }
0x14b3   :  { %v1195_v15 = vmul.f32 %v1460_v28, %v1075_v11 }
0x150b   :  { %v1191_v26 = vpop.permute.xlu1 %1190 }
0x150c   :  { %v1192_v27 = vrot.slane %v1191_v26, 2 }
0x150e   :  { %1461 = vtanh.f32 %v1192_v27 }
0x1518   :  { %v1462_v8 = vpop.eup %1461 }
0x1519   :  { %v1196_v29 = vmul.f32 %v1462_v8, %v1460_v28 }
0x151b   :  { %1198 = vrot.lane.b32.xlu0 %v1196_v29, %s1495_s15 }
0x151f   :  { %1223 = vrot.lane.b32.xlu0 %v1222_v9, %s1497_s20 }
0x158d   :  { %v1199_v17 = vpop.permute.xlu0 %1198 }
0x158e   :  { %v1201_v21 = vadd.f32 %v1199_v17, %v1195_v15 }
0x1590   :  { %1463 = vtanh.f32 %v1201_v21 }
0x1591   :  { %v1224_v22 = vpop.permute.xlu0 %1223 }
0x1592   :  { %v1225_v23 = vrot.slane %v1224_v22, 6 }
0x1594   :  { %v1227_v37 = vsel %vm1226_vm5, %v1225_v23, %v1224_v22 }
0x159a   :  { %v1464_v30 = vpop.eup %1463 }
0x159b   :  { %1204 = vrot.lane.b32.xlu1 %v1464_v30, %s1495_s15 }
0x160d   :  { %v1205_v31 = vpop.permute.xlu1 %1204 }
0x160e   :  { %v1206_v32 = vrot.slane %v1205_v31, 6 }
0x1610   :  { %v1207_v33 = vsel %vm206_vm3, %v1206_v32, %v1205_v31 }
0x1611   :  { %v1209_v35 = vmul.f32 %v1460_v28, %v1207_v33 }
0x1613   :  { %v1229_v38 = vmul.f32 %v1227_v37, %v1209_v35 }
0x1615   :  { %v1237_v4 = vrot.slane %v1229_v38, %v1616_v40 }
0x1617   :  { %1239 = vrot.lane.b32.xlu1 %v1237_v4, %s1496_s18  ;;  %v1238_v41 = vcombine.high %v1237_v4, %v1237_v4 }
0x1619   :  { %1241 = vrot.lane.b32.xlu0 %v1238_v41, %s1496_s18 }
0x1689   :  { %v1240_v42 = vpop.permute.xlu1 %1239 }
0x168b   :  { %v1242_v43 = vpop.permute.xlu0 %1241 }
0x168c   :  { %v1243_v44 = vsel %vm340_vm4, %v1240_v42, %v1242_v43 }
0x168d   :  { %v1246_v45 = vsel %vm1245_vm6, %v1243_v44, 0.0 }
0x168e   :  { %1247 = vadd.xlane.f32.xlu1 %v1246_v45 }
0x171b   :  { %v1248_v47 = vpop.xlane.xlu1 %1247 }
0x171c   :  { %v1251_v48 = vadd.f32 %v1250_v46, %v1248_v47 }
0x171e   :  { %1253 = vst.msk [vmem:[%s1797_s6] sm:$0x3] %vm1252_vm7, %v1251_v48 }
0x171f   :  { %1258 = vsyncpa [#allocation4], 1 }

</bundles_post_ra>
